<compile_context>
chip_gen: v7x
topology: tpu7x:2x2x1
jax: 0.10.0
libtpu: 0.0.40
codegen_flags: <defaults>
</compile_context>

<pallas_src>
import functools

import jax
import jax.numpy as jnp
from jax import lax
from jax.experimental import pallas as pl
from jax.experimental.pallas import tpu as pltpu

HALF = 128  # module hard-codes narrow(0, 0, 128) / narrow(0, 128, 128)


def batch_criterion_kernel(y_ref, loss_ref, *, T):
    """Whole-problem kernel.  y_ref: [256, D] in VMEM, loss_ref: (1,1) in SMEM.

    Reference math (PyTorch forward):
      y3 = exp(y1 @ y2.T / T); y4 = y3 / rowsum(y3); prob_p = sum(log(diag(y4)))
      y6 = exp(y1 @ y1.T / T); y7 = log(1 - y6 / rowsum(y6))
      y8 = rowsum(y7) - diag(y7); prob_n = sum(y8)
      loss = (-prob_p - prob_n) / 128
    """
    n = HALF
    inv_T = jnp.float32(1.0 / T)

    y_all = y_ref[...].astype(jnp.float32)   # [256, D]
    y1 = y_all[:n, :]                        # [128, D], sublane-aligned slice

    # One MXU pass, contracting the last dim of both operands (no transpose):
    #   S[:, :128] = y1 @ y1.T / T   (negative block)
    #   S[:, 128:] = y1 @ y2.T / T   (positive block)
    S = lax.dot_general(
        y1, y_all,
        dimension_numbers=(((1,), (1,)), ((), ())),
        preferred_element_type=jnp.float32,
    ) * inv_T                                # [128, 256]

    # NOTE: matches reference semantics — no max-subtraction before exp
    # (reference overflows for T << 0.01 too; kept bit-compatible in spirit).
    E = jnp.exp(S)                           # single long EUP burst

    eye = (lax.broadcasted_iota(jnp.int32, (n, n), 0)
           == lax.broadcasted_iota(jnp.int32, (n, n), 1))

    # ---- positive term ----
    # prob_p = sum_i log(y4[i,i]) = sum_i S_pos[i,i] - sum_i log(rowsum(E_pos[i,:]))
    S_pos = S[:, n:]
    E_pos = E[:, n:]
    rowsum_pos = jnp.sum(E_pos, axis=1, keepdims=True)           # [128, 1]
    prob_p = jnp.sum(jnp.where(eye, S_pos, 0.0)) - jnp.sum(jnp.log(rowsum_pos))

    # ---- negative term ----
    E_neg = E[:, :n]
    rowsum_neg = jnp.sum(E_neg, axis=1, keepdims=True)            # [128, 1]
    inv_rowsum = pl.reciprocal(rowsum_neg, approx=True)           # 128 EUP recips
    ratio = E_neg * inv_rowsum                                    # one VALU pass
    # Mask diag at the log argument: log(1)=0 drops it from the row sum and
    # avoids -inf - (-inf) when the diagonal ratio saturates to 1.
    prob_n = jnp.sum(jnp.log(jnp.where(eye, 1.0, 1.0 - ratio)))

    loss_ref[0, 0] = (-prob_p - prob_n) / jnp.float32(n)


def batch_criterion_forward(y, T):
    """y: [>=256, D] float32. Returns scalar loss (float32)."""
    assert y.shape[0] >= 2 * HALF, "forward() requires at least 256 rows"
    y = y[:2 * HALF]
    D = y.shape[1]

    kernel = functools.partial(batch_criterion_kernel, T=float(T))
    cost = pl.CostEstimate(
        flops=2 * HALF * (2 * HALF) * D,                     # one [128,D]x[D,256]
        transcendentals=HALF * (2 * HALF)                    # exp over [128,256]
        + HALF * HALF                                        # log over neg block
        + 2 * HALF,                                          # rowsum logs + recips
        bytes_accessed=2 * HALF * D * 4 + 4,
    )
    out = pl.pallas_call(
        kernel,
        out_shape=jax.ShapeDtypeStruct((1, 1), jnp.float32),
        in_specs=[pl.BlockSpec(memory_space=pltpu.MemorySpace.VMEM)],
        out_specs=pl.BlockSpec(memory_space=pltpu.MemorySpace.SMEM),
        cost_estimate=cost,
    )(y)
    return out[0, 0]


def _reference_forward(y, T):
    """Plain-JAX transcription of the PyTorch forward, for verification."""
    y1 = y[:HALF]
    y2 = y[HALF:2 * HALF]
    y3 = jnp.exp(y1 @ y2.T / T)
    y4 = y3 / y3.sum(1, keepdims=True)
    prob_p = jnp.log(jnp.diag(y4)).sum()
    y6 = jnp.exp(y1 @ y1.T / T)
    y7 = jnp.log(1.0 - y6 / y6.sum(1, keepdims=True))
    y8 = y7.sum(1) - jnp.diag(y7)
    prob_n = y8.sum()
    return (-prob_p - prob_n) / HALF


if __name__ == "__main__":
    T = 0.1  # temperature; the only "parameter" of the module
    D = 64   # embedding dim (small; the batch axis must be 256 per forward())

    key = jax.random.PRNGKey(0)
    y = jax.random.normal(key, (2 * HALF, D), dtype=jnp.float32)
    # Embeddings in this loss are L2-normalized rows.
    y = y / jnp.linalg.norm(y, axis=1, keepdims=True)

    loss = batch_criterion_forward(y, T)
    loss = jax.block_until_ready(loss)

    ref = _reference_forward(y, T)
    assert jnp.allclose(loss, ref, rtol=1e-4, atol=1e-4), (loss, ref)

    print("KERNEL_OK")
</pallas_src>

<mosaic_0001>
module attributes {stable_mosaic.version = 11 : i64} {
  func.func @batch_criterion_kernel(%arg0: memref<256x64xf32, #tpu.memory_space<vmem>>, %arg1: memref<1x1xf32, #tpu.memory_space<smem>>) attributes {dimension_semantics = [], scalar_prefetch = 0 : i64, scratch_operands = 0 : i64, tpu.core_type = #tpu.core_type<tc>} {
    %c0 = arith.constant 0 : index
    %c0_0 = arith.constant 0 : index
    %0 = vector.load %arg0[%c0, %c0_0] : memref<256x64xf32, #tpu.memory_space<vmem>>, vector<256x64xf32>
    %1 = vector.extract_strided_slice %0 {offsets = [0, 0], sizes = [128, 64], strides = [1, 1]} : vector<256x64xf32> to vector<128x64xf32>
    %cst = arith.constant dense<0.000000e+00> : vector<128x256xf32>
    %2 = tpu.matmul %1, %0, %cst {dimension_numbers = #tpu.dot_dimension_numbers<[1], [1], [0], [0], [0, 0, 1, 0], [], []>} : vector<128x64xf32>, vector<256x64xf32>, vector<128x256xf32> -> vector<128x256xf32>
    %cst_1 = arith.constant 1.000000e+01 : f32
    %3 = vector.broadcast %cst_1 : f32 to vector<128x256xf32>
    %4 = arith.mulf %2, %3 : vector<128x256xf32>
    %5 = math.exp %4 : vector<128x256xf32>
    %6 = tpu.iota {dimensions = array<i32: 0>} : vector<128x128xi32>
    %7 = tpu.iota {dimensions = array<i32: 1>} : vector<128x128xi32>
    %8 = arith.cmpi eq, %6, %7 : vector<128x128xi32>
    %9 = vector.extract_strided_slice %4 {offsets = [0, 128], sizes = [128, 128], strides = [1, 1]} : vector<128x256xf32> to vector<128x128xf32>
    %10 = vector.extract_strided_slice %5 {offsets = [0, 128], sizes = [128, 128], strides = [1, 1]} : vector<128x256xf32> to vector<128x128xf32>
    %cst_2 = arith.constant dense<0.000000e+00> : vector<128xf32>
    %11 = vector.multi_reduction <add>, %10, %cst_2 [1] : vector<128x128xf32> to vector<128xf32>
    %12 = vector.shape_cast %11 : vector<128xf32> to vector<128x1xf32>
    %cst_3 = arith.constant 0.000000e+00 : f32
    %13 = vector.broadcast %cst_3 : f32 to vector<128x128xf32>
    %14 = arith.select %8, %9, %13 : vector<128x128xi1>, vector<128x128xf32>
    %15 = vector.shape_cast %14 : vector<128x128xf32> to vector<1x128x128xf32>
    %cst_4 = arith.constant dense<0.000000e+00> : vector<1xf32>
    %16 = vector.multi_reduction <add>, %15, %cst_4 [1, 2] : vector<1x128x128xf32> to vector<1xf32>
    %17 = vector.shape_cast %16 : vector<1xf32> to vector<1x1x1xf32>
    %18 = vector.extract %17[0, 0, 0] : f32 from vector<1x1x1xf32>
    %19 = math.log %12 : vector<128x1xf32>
    %20 = vector.shape_cast %19 : vector<128x1xf32> to vector<1x128x1xf32>
    %cst_5 = arith.constant dense<0.000000e+00> : vector<1xf32>
    %21 = vector.multi_reduction <add>, %20, %cst_5 [1, 2] : vector<1x128x1xf32> to vector<1xf32>
    %22 = vector.shape_cast %21 : vector<1xf32> to vector<1x1x1xf32>
    %23 = vector.extract %22[0, 0, 0] : f32 from vector<1x1x1xf32>
    %24 = arith.subf %18, %23 : f32
    %25 = vector.extract_strided_slice %5 {offsets = [0, 0], sizes = [128, 128], strides = [1, 1]} : vector<128x256xf32> to vector<128x128xf32>
    %cst_6 = arith.constant dense<0.000000e+00> : vector<128xf32>
    %26 = vector.multi_reduction <add>, %25, %cst_6 [1] : vector<128x128xf32> to vector<128xf32>
    %27 = vector.shape_cast %26 : vector<128xf32> to vector<128x1xf32>
    %28 = tpu.reciprocal %27 {approx = true} : vector<128x1xf32> -> vector<128x1xf32>
    %29 = vector.broadcast %28 : vector<128x1xf32> to vector<128x128xf32>
    %30 = arith.mulf %25, %29 : vector<128x128xf32>
    %cst_7 = arith.constant 1.000000e+00 : f32
    %31 = vector.broadcast %cst_7 : f32 to vector<128x128xf32>
    %32 = arith.subf %31, %30 : vector<128x128xf32>
    %cst_8 = arith.constant 1.000000e+00 : f32
    %33 = vector.broadcast %cst_8 : f32 to vector<128x128xf32>
    %34 = arith.select %8, %33, %32 : vector<128x128xi1>, vector<128x128xf32>
    %35 = math.log %34 : vector<128x128xf32>
    %36 = vector.shape_cast %35 : vector<128x128xf32> to vector<1x128x128xf32>
    %cst_9 = arith.constant dense<0.000000e+00> : vector<1xf32>
    %37 = vector.multi_reduction <add>, %36, %cst_9 [1, 2] : vector<1x128x128xf32> to vector<1xf32>
    %38 = vector.shape_cast %37 : vector<1xf32> to vector<1x1x1xf32>
    %39 = vector.extract %38[0, 0, 0] : f32 from vector<1x1x1xf32>
    %cst_10 = arith.constant 0.000000e+00 : f32
    %40 = arith.subf %cst_10, %24 : f32
    %41 = arith.subf %40, %39 : f32
    %cst_11 = arith.constant 1.280000e+02 : f32
    %42 = arith.divf %41, %cst_11 : f32
    %c0_12 = arith.constant 0 : index
    %c0_13 = arith.constant 0 : index
    %43 = memref.load %arg1[%c0_12, %c0_13] : memref<1x1xf32, #tpu.memory_space<smem>>
    memref.store %42, %arg1[%c0_12, %c0_13] : memref<1x1xf32, #tpu.memory_space<smem>>
    return
  }
}

</mosaic_0001>

<bundles_post_ra>
// kernel: tpu_custom_call.1
= control target key start
LH: loop header
LB: loop body
LE: loop exit
PB: predicated region body
PF: predicated region fallthrough
CT: control target
= control target key end

     0   :  { %vm41_vm0 = vcmask 523264   ;;  %s1692_s0 = inlined_call_operand.vmem [shape: f32[256,64], index: 0, kind: input, shape index: {}]   ;;  %s1693_s1 = inlined_call_operand.hbm [shape: f32[1,1], index: 1, kind: output, shape index: {}]  }
   0x1   :  { %v25_v0 = vld [vmem:[%s1692_s0 + $0x80] sm:$0xff]  ;;  %v26_v1 = vld [vmem:[%s1692_s0 + $0x88] sm:$0xff]  ;;  %vm1127_vm1 = vmpackc.low %vm41_vm0, %vm41_vm0 }
   0x2   :  { %v1123_v2 = vld [vmem:[%s1692_s0] sm:$0xff]  ;;  %v860_v3 = vpack.c.bf16 %v26_v1, %v25_v0  ;;  %v1134_v5 = vld [vmem:[%s1692_s0 + $0x8] sm:$0xff]  ;;  %v27_v6 = vld [vmem:[%s1692_s0 + $0x90] sm:$0xff] }
   0x3   :  { %828 = vmatprep.mubr.msk.f32.mxu0 %vm41_vm0, %v1123_v2  ;;  %v863_v7 = vpack.c.bf16 %v1134_v5, %v1123_v2  ;;  %v28_v8 = vld [vmem:[%s1692_s0 + $0x98] sm:$0xff]  ;;  %v1161_v10 = vld [vmem:[%s1692_s0 + $0x10] sm:$0xff]  ;;  %v29_v12 = vld [vmem:[%s1692_s0 + $0xa0] sm:$0xff] }
   0x4   :  { %862 = vmatprep.subr.msk.bf16.mxu0 %vm1127_vm1, %v860_v3  ;;  %908 = vmatprep.subr.msk.bf16.mxu1 %vm1127_vm1, %v860_v3  ;;  %v866_v9 = vpack.c.bf16 %v28_v8, %v27_v6  ;;  %v1166_v11 = vld [vmem:[%s1692_s0 + $0x18] sm:$0xff]  ;;  %v30_v13 = vld [vmem:[%s1692_s0 + $0xa8] sm:$0xff]  ;;  %v1177_v14 = vld [vmem:[%s1692_s0 + $0x40] sm:$0xff] }
   0x5   :  { %865 = vmatpush3.bf16.xpose.msk.msra.mxu0 %vm1127_vm1, %v863_v7  ;;  %916 = vmatpush3.bf16.xpose.msk.msra.mxu1 %vm1127_vm1, %v863_v7  ;;  %v869_v15 = vpack.c.bf16 %v1166_v11, %v1161_v10  ;;  %v872_v16 = vpack.c.bf16 %v30_v13, %v29_v12 }
   0x6   :  { %868 = vmatprep.subr.msk.bf16.mxu0 %vm1127_vm1, %v866_v9  ;;  %909 = vmatprep.subr.msk.bf16.mxu1 %vm1127_vm1, %v866_v9 }
   0x7   :  { %844 = vmatprep.mubr.msk.f32.mxu1 %vm41_vm0, %v1177_v14 }
   0x8   :  { %6 = vsyncpa [#allocation3], 0  ;;  %v1194_v17 = vld [vmem:[%s1692_s0 + $0x20] sm:$0xff]  ;;  %v1199_v18 = vld [vmem:[%s1692_s0 + $0x28] sm:$0xff]  ;;  %v395_v49 = vlaneseq  ;;  %s1091_s20 = scalar_lea.hbm %s1693_s1, 16 }
   0x9   :  { %v31_v19 = vld [vmem:[%s1692_s0 + $0xb0] sm:$0xff]  ;;  %v32_v20 = vld [vmem:[%s1692_s0 + $0xb8] sm:$0xff]  ;;  %v875_v21 = vpack.c.bf16 %v1199_v18, %v1194_v17  ;;  %v33_v25 = vld [vmem:[%s1692_s0 + $0xc0] sm:$0xff]  ;;  %p1092_p0 = scmp.ne.s32.totalorder %s1693_s1, %s1091_s20  ;;  %p1095_p1 = scmp.lt.u32.totalorder %s1091_s20, %s1693_s1 }
   0xa   :  { %v878_v22 = vpack.c.bf16 %v32_v20, %v31_v19  ;;  %v1220_v23 = vld [vmem:[%s1692_s0 + $0x30] sm:$0xff]  ;;  %v1225_v24 = vld [vmem:[%s1692_s0 + $0x38] sm:$0xff]  ;;  %v34_v26 = vld [vmem:[%s1692_s0 + $0xc8] sm:$0xff]  ;;  %v1357_v52 = vshrl.u32 %v395_v49, 7  ;;  %v1359_v56 = vand.u32 127, %v395_v49 }
   0xb   :  { %v881_v27 = vpack.c.bf16 %v1225_v24, %v1220_v23  ;;  %v884_v28 = vpack.c.bf16 %v34_v26, %v33_v25  ;;  %v18_v29 = vld [vmem:[%s1692_s0 + $0x48] sm:$0xff]  ;;  %v35_v30 = vld [vmem:[%s1692_s0 + $0xd0] sm:$0xff]  ;;  %v36_v31 = vld [vmem:[%s1692_s0 + $0xd8] sm:$0xff]  ;;  %p1097_p2 = pnand %p1095_p1, %p1092_p0 }
   0xc   :  { %v887_v32 = vpack.c.bf16 %v18_v29, %v1177_v14  ;;  %v890_v33 = vpack.c.bf16 %v36_v31, %v35_v30  ;;  %v19_v34 = vld [vmem:[%s1692_s0 + $0x50] sm:$0xff]  ;;  %v20_v35 = vld [vmem:[%s1692_s0 + $0x58] sm:$0xff]  ;;  %v37_v36 = vld [vmem:[%s1692_s0 + $0xe0] sm:$0xff]  ;;  %v1364_v59 = vadd.s32 8, %v1357_v52  ;;  %v1367_v62 = vadd.s32 16, %v1357_v52 }
   0xd   :  { %871 = vmatpush3.bf16.xpose.msk.msra.mxu0 %vm1127_vm1, %v869_v15  ;;  %917 = vmatpush3.bf16.xpose.msk.msra.mxu1 %vm1127_vm1, %v869_v15  ;;  %v38_v37 = vld [vmem:[%s1692_s0 + $0xe8] sm:$0xff]  ;;  %v893_v38 = vpack.c.bf16 %v20_v35, %v19_v34  ;;  %v21_v40 = vld [vmem:[%s1692_s0 + $0x60] sm:$0xff]  ;;  %v39_v42 = vld [vmem:[%s1692_s0 + $0xf0] sm:$0xff]  ;;  %vm414_vm2 = vcmp.eq.s32.totalorder %v1357_v52, %v1359_v56  ;;  %v1376_v7 = vadd.s32 24, %v1357_v52 }
   0xe   :  { %874 = vmatprep.subr.msk.bf16.mxu0 %vm1127_vm1, %v872_v16  ;;  %910 = vmatprep.subr.msk.bf16.mxu1 %vm1127_vm1, %v872_v16  ;;  %v896_v39 = vpack.c.bf16 %v38_v37, %v37_v36  ;;  %v22_v41 = vld [vmem:[%s1692_s0 + $0x68] sm:$0xff]  ;;  %v40_v43 = vld [vmem:[%s1692_s0 + $0xf8] sm:$0xff]  ;;  %v23_v46 = vld [vmem:[%s1692_s0 + $0x70] sm:$0xff]  ;;  %vm415_vm3 = vcmp.eq.s32.totalorder %v1364_v59, %v1359_v56  ;;  %vm416_vm4 = vcmp.eq.s32.totalorder %v1367_v62, %v1359_v56 }
   0xf   :  { %v899_v44 = vpack.c.bf16 %v22_v41, %v21_v40  ;;  %v902_v45 = vpack.c.bf16 %v40_v43, %v39_v42  ;;  %v24_v47 = vld [vmem:[%s1692_s0 + $0x78] sm:$0xff]  ;;  %vm417_vm5 = vcmp.eq.s32.totalorder %v1376_v7, %v1359_v56 }
  0x10   :  { %v905_v48 = vpack.c.bf16 %v24_v47, %v23_v46 }
  0x15   :  { %877 = vmatpush3.bf16.xpose.msk.msra.mxu0 %vm1127_vm1, %v875_v21  ;;  %918 = vmatpush3.bf16.xpose.msk.msra.mxu1 %vm1127_vm1, %v875_v21 }
  0x16   :  { %880 = vmatprep.subr.msk.bf16.mxu0 %vm1127_vm1, %v878_v22  ;;  %911 = vmatprep.subr.msk.bf16.mxu1 %vm1127_vm1, %v878_v22 }
  0x1d   :  { %883 = vmatpush3.bf16.xpose.msk.msra.mxu0 %vm1127_vm1, %v881_v27  ;;  %919 = vmatpush3.bf16.xpose.msk.msra.mxu1 %vm1127_vm1, %v881_v27 }
  0x1e   :  { %886 = vmatprep.subr.msk.bf16.mxu0 %vm1127_vm1, %v884_v28  ;;  %912 = vmatprep.subr.msk.bf16.mxu1 %vm1127_vm1, %v884_v28  ;;  %v1394_v28 = vadd.s32 32, %v1357_v52 }
  0x20   :  { %vm418_vm6 = vcmp.eq.s32.totalorder %v1394_v28, %v1359_v56 }
  0x25   :  { %889 = vmatpush3.bf16.xpose.msk.msra.mxu0 %vm1127_vm1, %v887_v32  ;;  %920 = vmatpush3.bf16.xpose.msk.msra.mxu1 %vm1127_vm1, %v887_v32 }
  0x26   :  { %892 = vmatprep.subr.msk.bf16.mxu0 %vm1127_vm1, %v890_v33  ;;  %913 = vmatprep.subr.msk.bf16.mxu1 %vm1127_vm1, %v890_v33 }
  0x2d   :  { %895 = vmatpush3.bf16.xpose.msk.msra.mxu0 %vm1127_vm1, %v893_v38  ;;  %921 = vmatpush3.bf16.xpose.msk.msra.mxu1 %vm1127_vm1, %v893_v38 }
  0x2e   :  { %898 = vmatprep.subr.msk.bf16.mxu0 %vm1127_vm1, %v896_v39  ;;  %914 = vmatprep.subr.msk.bf16.mxu1 %vm1127_vm1, %v896_v39 }
  0x35   :  { %901 = vmatpush3.bf16.xpose.msk.msra.mxu0 %vm1127_vm1, %v899_v44  ;;  %922 = vmatpush3.bf16.xpose.msk.msra.mxu1 %vm1127_vm1, %v899_v44 }
  0x36   :  { %904 = vmatprep.subr.msk.bf16.mxu0 %vm1127_vm1, %v902_v45  ;;  %915 = vmatprep.subr.msk.bf16.mxu1 %vm1127_vm1, %v902_v45 }
  0x3d   :  { %907 = vmatpush3.bf16.xpose.msk.msra.mxu0 %vm1127_vm1, %v905_v48  ;;  %923 = vmatpush3.bf16.xpose.msk.msra.mxu1 %vm1127_vm1, %v905_v48 }
  0x44   :  { %829 = vmatmul.mubr.msk.f32.vlgmr.msra.gmra.mrb[0].mxu0 %vm41_vm0, %v1123_v2  ;;  %845 = vmatmul.mubr.msk.f32.vlgmr.msra.gmra.mrb[0].mxu1 %vm41_vm0, %v1177_v14 }
  0x45   :  { %830 = vmatprep.mubr.msk.f32.mxu0 %vm41_vm0, %v1134_v5  ;;  %846 = vmatprep.mubr.msk.f32.mxu1 %vm41_vm0, %v18_v29 }
  0x48   :  { %831 = vmatmul.mubr.msk.f32.gmra.mrb[2].mxu0 %vm41_vm0, %v1134_v5  ;;  %847 = vmatmul.mubr.msk.f32.gmra.mrb[2].mxu1 %vm41_vm0, %v18_v29 }
  0x49   :  { %832 = vmatprep.mubr.msk.f32.mxu0 %vm41_vm0, %v1161_v10  ;;  %848 = vmatprep.mubr.msk.f32.mxu1 %vm41_vm0, %v19_v34 }
  0x4c   :  { %833 = vmatmul.mubr.msk.f32.gmra.mrb[4].mxu0 %vm41_vm0, %v1161_v10  ;;  %849 = vmatmul.mubr.msk.f32.gmra.mrb[4].mxu1 %vm41_vm0, %v19_v34 }
  0x4d   :  { %834 = vmatprep.mubr.msk.f32.mxu0 %vm41_vm0, %v1166_v11  ;;  %850 = vmatprep.mubr.msk.f32.mxu1 %vm41_vm0, %v20_v35 }
  0x50   :  { %835 = vmatmul.mubr.msk.f32.gmra.mrb[6].mxu0 %vm41_vm0, %v1166_v11  ;;  %851 = vmatmul.mubr.msk.f32.gmra.mrb[6].mxu1 %vm41_vm0, %v20_v35 }
  0x51   :  { %836 = vmatprep.mubr.msk.f32.mxu0 %vm41_vm0, %v1194_v17  ;;  %852 = vmatprep.mubr.msk.f32.mxu1 %vm41_vm0, %v21_v40 }
  0x54   :  { %837 = vmatmul.mubr.msk.f32.gmra.mrb[8].mxu0 %vm41_vm0, %v1194_v17  ;;  %853 = vmatmul.mubr.msk.f32.gmra.mrb[8].mxu1 %vm41_vm0, %v21_v40 }
  0x55   :  { %838 = vmatprep.mubr.msk.f32.mxu0 %vm41_vm0, %v1199_v18  ;;  %854 = vmatprep.mubr.msk.f32.mxu1 %vm41_vm0, %v22_v41 }
  0x58   :  { %839 = vmatmul.mubr.msk.f32.gmra.mrb[10].mxu0 %vm41_vm0, %v1199_v18  ;;  %855 = vmatmul.mubr.msk.f32.gmra.mrb[10].mxu1 %vm41_vm0, %v22_v41  ;;  %v1412_v41 = vadd.s32 40, %v1357_v52 }
  0x59   :  { %840 = vmatprep.mubr.msk.f32.mxu0 %vm41_vm0, %v1220_v23  ;;  %856 = vmatprep.mubr.msk.f32.mxu1 %vm41_vm0, %v23_v46 }
  0x5a   :  { %vm419_vm7 = vcmp.eq.s32.totalorder %v1412_v41, %v1359_v56 }
  0x5c   :  { %841 = vmatmul.mubr.msk.f32.gmra.mrb[12].mxu0 %vm41_vm0, %v1220_v23  ;;  %857 = vmatmul.mubr.msk.f32.gmra.mrb[12].mxu1 %vm41_vm0, %v23_v46 }
  0x5d   :  { %842 = vmatprep.mubr.msk.f32.mxu0 %vm41_vm0, %v1225_v24  ;;  %858 = vmatprep.mubr.msk.f32.mxu1 %vm41_vm0, %v24_v47 }
  0x60   :  { %843 = vmatmul.mubr.msk.f32.gmra.mrb[14].mxu0 %vm41_vm0, %v1225_v24  ;;  %859 = vmatmul.mubr.msk.f32.gmra.mrb[14].mxu1 %vm41_vm0, %v24_v47 }
 0x117   :  { %v204_v50 = vpop.f32.mrb[0].mxu0  ;;  %v252_v51 = vpop.f32.mrb[0].mxu1 }
 0x118   :  { %v299_v53 = vmul.f32 10.0, %v204_v50  ;;  %v315_v54 = vmul.f32 10.0, %v252_v51  ;;  %v206_v55 = vpop.f32.mrb[1].mxu0  ;;  %v1361_v57 = vpop.f32.mrb[1].mxu1 }
 0x119   :  { %v300_v58 = vmul.f32 10.0, %v206_v55  ;;  %v1427_v55 = vadd.s32 48, %v1357_v52 }
 0x11a   :  { %v331_v60 = vmul.f32 1.442695, %v299_v53  ;;  %v363_v61 = vmul.f32 1.442695, %v315_v54 }
 0x11b   :  { %v333_v63 = vmul.f32 1.442695, %v300_v58  ;;  %v210_v0 = vpop.f32.mrb[2].mxu0  ;;  %v258_v1 = vpop.f32.mrb[2].mxu1  ;;  %v462_v12 = vsel %vm414_vm2, %v300_v58, 0.0  ;;  %vm420_vm8 = vcmp.eq.s32.totalorder %v1427_v55, %v1359_v56 }
 0x11c   :  { %931 = vpow2.f32 %v331_v60  ;;  %v301_v2 = vmul.f32 10.0, %v210_v0  ;;  %v212_v3 = vpop.f32.mrb[3].mxu0  ;;  %v317_v4 = vmul.f32 10.0, %v258_v1  ;;  %v1373_v5 = vpop.f32.mrb[3].mxu1 }
 0x11d   :  { %933 = vpow2.f32 %v363_v61  ;;  %v302_v6 = vmul.f32 10.0, %v212_v3 }
 0x11e   :  { %v335_v8 = vmul.f32 1.442695, %v301_v2  ;;  %v367_v10 = vmul.f32 1.442695, %v317_v4  ;;  %935 = vpow2.f32 %v333_v63  ;;  %v1437_v4 = vadd.s32 56, %v1357_v52 }
 0x11f   :  { %v216_v9 = vpop.f32.mrb[4].mxu0  ;;  %v264_v11 = vpop.f32.mrb[4].mxu1  ;;  %v463_v13 = vsel %vm415_vm3, %v302_v6, 0.0  ;;  %v337_v16 = vmul.f32 1.442695, %v302_v6 }
 0x120   :  { %v303_v14 = vmul.f32 10.0, %v216_v9  ;;  %v218_v15 = vpop.f32.mrb[5].mxu0  ;;  %937 = vpow2.f32 %v335_v8  ;;  %v478_v17 = vadd.f32 %v463_v13, %v462_v12  ;;  %v1386_v19 = vpop.f32.mrb[5].mxu1  ;;  %v319_v21 = vmul.f32 10.0, %v264_v11 }
 0x121   :  { %v304_v18 = vmul.f32 10.0, %v218_v15  ;;  %939 = vpow2.f32 %v367_v10  ;;  %vm421_vm9 = vcmp.eq.s32.totalorder %v1437_v4, %v1359_v56 }
 0x122   :  { %v339_v20 = vmul.f32 1.442695, %v303_v14  ;;  %941 = vpow2.f32 %v337_v16  ;;  %v371_v32 = vmul.f32 1.442695, %v319_v21  ;;  %v1449_v16 = vadd.s32 64, %v1357_v52 }
 0x123   :  { %v341_v22 = vmul.f32 1.442695, %v304_v18  ;;  %v464_v23 = vsel %vm416_vm4, %v304_v18, 0.0  ;;  %v222_v24 = vpop.f32.mrb[6].mxu0  ;;  %v270_v25 = vpop.f32.mrb[6].mxu1  ;;  %v1455_v18 = vadd.s32 80, %v1357_v52 }
 0x124   :  { %v479_v26 = vadd.f32 %v478_v17, %v464_v23  ;;  %v224_v27 = vpop.f32.mrb[7].mxu0  ;;  %v1396_v29 = vpop.f32.mrb[7].mxu1  ;;  %943 = vpow2.f32 %v339_v20  ;;  %v305_v43 = vmul.f32 10.0, %v222_v24  ;;  %v321_v50 = vmul.f32 10.0, %v270_v25 }
 0x125   :  { %v306_v30 = vmul.f32 10.0, %v224_v27  ;;  %945 = vpow2.f32 %v341_v22  ;;  %v1452_v17 = vadd.s32 72, %v1357_v52  ;;  %v1461_v21 = vadd.s32 88, %v1357_v52 }
 0x126   :  { %v1398_v31 = vpop.eup %931  ;;  %947 = vpow2.f32 %v371_v32  ;;  %v343_v61 = vmul.f32 1.442695, %v305_v43  ;;  %v375_v2 = vmul.f32 1.442695, %v321_v50  ;;  %v1470_v25 = vmul.f32 10.0, %v1361_v57 }
 0x127   :  { %v1400_v33 = vpop.eup %933  ;;  %v345_v34 = vmul.f32 1.442695, %v306_v30  ;;  %v465_v35 = vsel %vm417_vm5, %v306_v30, 0.0  ;;  %576 = vadd.xlane.f32.xlu0 %v1398_v31  ;;  %v228_v36 = vpop.f32.mrb[8].mxu0  ;;  %vm422_vm10 = vcmp.eq.s32.totalorder %v1449_v16, %v1359_v56  ;;  %vm423_vm11 = vcmp.eq.s32.totalorder %v1452_v17, %v1359_v56 }
 0x128   :  { %v1406_v37 = vpop.f32.mrb[8].mxu1  ;;  %v480_v38 = vadd.f32 %v479_v26, %v465_v35  ;;  %592 = vadd.xlane.f32.xlu1 %v1400_v33  ;;  %v307_v39 = vmul.f32 10.0, %v228_v36  ;;  %v230_v40 = vpop.f32.mrb[9].mxu0  ;;  %vm424_vm12 = vcmp.eq.s32.totalorder %v1455_v18, %v1359_v56  ;;  %v1482_v57 = vadd.s32 96, %v1357_v52 }
 0x129   :  { %v1414_v42 = vpop.f32.mrb[9].mxu1  ;;  %v308_v44 = vmul.f32 10.0, %v230_v40  ;;  %v936_v45 = vpop.eup %935  ;;  %949 = vpow2.f32 %v345_v34  ;;  %v1485_v40 = vmul.f32 10.0, %v1373_v5  ;;  %vm425_vm13 = vcmp.eq.s32.totalorder %v1461_v21, %v1359_v56 }
 0x12a   :  { %v1416_v46 = vpop.eup %937  ;;  %v347_v47 = vmul.f32 1.442695, %v307_v39  ;;  %vm426_vm14 = vcmp.eq.s32.totalorder %v1482_v57, %v1359_v56 }
 0x12b   :  { %v466_v48 = vsel %vm418_vm6, %v308_v44, 0.0  ;;  %v234_v49 = vpop.f32.mrb[10].mxu0  ;;  %v1421_v51 = vpop.f32.mrb[10].mxu1  ;;  %578 = vadd.xlane.f32.xlu0 %v1416_v46  ;;  %v349_v14 = vmul.f32 1.442695, %v308_v44 }
 0x12c   :  { %v481_v53 = vadd.f32 %v480_v38, %v466_v48  ;;  %430 = vadd.xlane.f32.xlu1 %v936_v45  ;;  %v236_v54 = vpop.f32.mrb[11].mxu0  ;;  %v1429_v58 = vpop.f32.mrb[11].mxu1  ;;  %951 = vpow2.f32 %v347_v47  ;;  %v309_v9 = vmul.f32 10.0, %v234_v49  ;;  %v323_v45 = vmul.f32 10.0, %v1406_v37 }
 0x12d   :  { %v1431_v60 = vpop.eup %939  ;;  %v310_v63 = vmul.f32 10.0, %v236_v54  ;;  %953 = vpow2.f32 %v343_v61  ;;  %v1496_v48 = vadd.s32 104, %v1357_v52  ;;  %v470_v49 = vsel %vm422_vm10, %v1470_v25, 0.0 }
 0x12e   :  { %v942_v0 = vpop.eup %941  ;;  %955 = vpow2.f32 %v375_v2  ;;  %v351_v26 = vmul.f32 1.442695, %v309_v9  ;;  %v1505_v37 = vmul.f32 10.0, %v1386_v19  ;;  %v1511_v61 = vmul.f32 10.0, %v1414_v42 }
 0x12f   :  { %v467_v1 = vsel %vm419_vm7, %v310_v63, 0.0  ;;  %v240_v3 = vpop.f32.mrb[12].mxu0  ;;  %v1439_v6 = vpop.f32.mrb[12].mxu1  ;;  %432 = vadd.xlane.f32.xlu0 %v942_v0  ;;  %957 = vpow2.f32 %v349_v14  ;;  %v353_v36 = vmul.f32 1.442695, %v310_v63  ;;  %v471_v19 = vsel %vm423_vm11, %v1485_v40, 0.0 }
 0x130   :  { %v1441_v8 = vpop.eup %943  ;;  %v482_v10 = vadd.f32 %v481_v53, %v467_v1  ;;  %594 = vadd.xlane.f32.xlu1 %v1431_v60  ;;  %v242_v11 = vpop.f32.mrb[13].mxu0  ;;  %v311_v38 = vmul.f32 10.0, %v240_v3  ;;  %959 = vpow2.f32 %v351_v26  ;;  %v1508_v53 = vmul.f32 10.0, %v1396_v29 }
 0x131   :  { %v1446_v12 = vpop.f32.mrb[13].mxu1  ;;  %v946_v13 = vpop.eup %945  ;;  %v312_v15 = vmul.f32 10.0, %v242_v11  ;;  %961 = vpow2.f32 %v353_v36  ;;  %v379_v0 = vmul.f32 1.442695, %v323_v45  ;;  %v325_v1 = vmul.f32 10.0, %v1421_v51 }
 0x132   :  { %v1467_v24 = vpop.eup %947  ;;  %v355_v50 = vmul.f32 1.442695, %v311_v38  ;;  %vm427_vm15 = vcmp.eq.s32.totalorder %v1496_v48, %v1359_v56  ;;  %v1527_v42 = vadd.s32 112, %v1357_v52  ;;  %v472_v3 = vsel %vm424_vm12, %v1505_v37, 0.0 }
 0x133   :  { %v468_v20 = vsel %vm420_vm8, %v312_v15, 0.0  ;;  %v246_v22 = vpop.f32.mrb[14].mxu0  ;;  %v1465_v23 = vpop.f32.mrb[14].mxu1  ;;  %434 = vadd.xlane.f32.xlu0 %v946_v13  ;;  %v357_v51 = vmul.f32 1.442695, %v312_v15  ;;  %v326_v9 = vmul.f32 10.0, %v1429_v58 }
 0x134   :  { %v483_v27 = vadd.f32 %v482_v10, %v468_v20  ;;  %580 = vadd.xlane.f32.xlu1 %v1441_v8  ;;  %v313_v30 = vmul.f32 10.0, %v246_v22  ;;  %v248_v32 = vpop.f32.mrb[15].mxu0  ;;  %v296_v34 = vpop.f32.mrb[15].mxu1  ;;  %v473_v10 = vsel %vm425_vm13, %v1508_v53, 0.0  ;;  %v474_v11 = vsel %vm426_vm14, %v1511_v61, 0.0 }
 0x135   :  { %v950_v35 = vpop.eup %949  ;;  %v1473_v39 = vmul.f32 10.0, %v248_v32  ;;  %v1545_v14 = vadd.s32 120, %v1357_v52  ;;  %v383_v22 = vmul.f32 1.442695, %v325_v1  ;;  %v327_v15 = vmul.f32 10.0, %v1439_v6 }
 0x136   :  { %v359_v43 = vmul.f32 1.442695, %v313_v30  ;;  %v1498_v5 = vpop.eup %951  ;;  %v328_v58 = vmul.f32 10.0, %v1446_v12  ;;  %vm428_vm0 = vcmp.eq.s32.totalorder %v1527_v42, %v1359_v56  ;;  %v475_v30 = vsel %vm427_vm15, %v326_v9, 0.0 }
 0x137   :  { %v469_v44 = vsel %vm421_vm9, %v1473_v39, 0.0  ;;  %436 = vadd.xlane.f32.xlu0 %v950_v35  ;;  %v1515_v63 = vpop.eup %953  ;;  %v330_v32 = vmul.f32 10.0, %v296_v34  ;;  %vm429_vm1 = vcmp.eq.s32.totalorder %v1545_v14, %v1359_v56  ;;  %v387_v36 = vmul.f32 1.442695, %v327_v15 }
 0x138   :  { %v484_v47 = vadd.f32 %v483_v27, %v469_v44  ;;  %596 = vadd.xlane.f32.xlu1 %v1467_v24  ;;  %963 = vpow2.f32 %v359_v43  ;;  %v1529_v2 = vpop.eup %955  ;;  %v365_v27 = vmul.f32 1.442695, %v1470_v25  ;;  %v476_v38 = vsel %vm428_vm0, %v328_v58, 0.0 }
 0x139   :  { %965 = vpow2.f32 %v355_v50  ;;  %v958_v20 = vpop.eup %957  ;;  %v329_v25 = vmul.f32 10.0, %v1465_v23  ;;  %v361_v44 = vmul.f32 1.442695, %v1473_v39  ;;  %v477_v45 = vsel %vm429_vm1, %v330_v32, 0.0 }
 0x13a   :  { %v485_v54 = vadd.f32 %v484_v47, %v470_v49  ;;  %967 = vpow2.f32 %v379_v0  ;;  %v1556_v35 = vpop.eup %959  ;;  %v373_v0 = vmul.f32 1.442695, %v1505_v37 }
 0x13b   :  { %584 = vadd.xlane.f32.xlu0 %v1498_v5  ;;  %969 = vpow2.f32 %v357_v51  ;;  %v962_v12 = vpop.eup %961  ;;  %v391_v50 = vmul.f32 1.442695, %v329_v25  ;;  %v381_v51 = vmul.f32 1.442695, %v1511_v61 }
 0x13c   :  { %v486_v29 = vadd.f32 %v485_v54, %v471_v19  ;;  %582 = vadd.xlane.f32.xlu1 %v1515_v63  ;;  %971 = vpow2.f32 %v383_v22  ;;  %v369_v19 = vmul.f32 1.442695, %v1485_v40 }
 0x13d   :  { %973 = vpow2.f32 %v365_v27 }
 0x13e   :  { %v487_v13 = vadd.f32 %v486_v29, %v472_v3  ;;  %975 = vpow2.f32 %v387_v36  ;;  %v377_v29 = vmul.f32 1.442695, %v1508_v53  ;;  %v393_v53 = vmul.f32 1.442695, %v330_v32 }
 0x13f   :  { %438 = vadd.xlane.f32.xlu0 %v958_v20  ;;  %977 = vpow2.f32 %v361_v44 }
 0x140   :  { %v488_v26 = vadd.f32 %v487_v13, %v473_v10  ;;  %598 = vadd.xlane.f32.xlu1 %v1529_v2  ;;  %979 = vpow2.f32 %v391_v50  ;;  %v385_v10 = vmul.f32 1.442695, %v326_v9 }
 0x141   :  { %981 = vpow2.f32 %v369_v19 }
 0x142   :  { %v489_v6 = vadd.f32 %v488_v26, %v474_v11  ;;  %v1565_v34 = vpop.eup %963  ;;  %983 = vpow2.f32 %v373_v0  ;;  %v389_v11 = vmul.f32 1.442695, %v328_v58 }
 0x143   :  { %440 = vadd.xlane.f32.xlu0 %v962_v12  ;;  %v1571_v49 = vpop.eup %965  ;;  %985 = vpow2.f32 %v377_v29 }
 0x144   :  { %v490_v43 = vadd.f32 %v489_v6, %v475_v30  ;;  %586 = vadd.xlane.f32.xlu1 %v1556_v35  ;;  %v1575_v54 = vpop.eup %967  ;;  %987 = vpow2.f32 %v381_v51 }
 0x145   :  { %v970_v39 = vpop.eup %969  ;;  %989 = vpow2.f32 %v385_v10 }
 0x146   :  { %v491_v47 = vadd.f32 %v490_v43, %v476_v38  ;;  %v1580_v1 = vpop.eup %971  ;;  %991 = vpow2.f32 %v389_v11 }
 0x147   :  { %588 = vadd.xlane.f32.xlu0 %v1571_v49  ;;  %v974_v3 = vpop.eup %973  ;;  %993 = vpow2.f32 %v393_v53 }
 0x148   :  { %590 = vadd.xlane.f32.xlu1 %v1565_v34  ;;  %v492_v23 = vadd.f32 %v491_v47, %v477_v45  ;;  %v1585_v40 = vpop.eup %975 }
 0x149   :  { %v978_v37 = vpop.eup %977 }
 0x14a   :  { %v1588_v13 = vpop.eup %979 }
 0x14b   :  { %442 = vadd.xlane.f32.xlu0 %v970_v39  ;;  %v982_v20 = vpop.eup %981 }
 0x14c   :  { %600 = vadd.xlane.f32.xlu1 %v1575_v54  ;;  %v984_v61 = vpop.eup %983 }
 0x14d   :  { %v986_v22 = vpop.eup %985 }
 0x14e   :  { %v988_v9 = vpop.eup %987 }
 0x14f   :  { %446 = vadd.xlane.f32.xlu0 %v974_v3  ;;  %v990_v15 = vpop.eup %989 }
 0x150   :  { %602 = vadd.xlane.f32.xlu1 %v1580_v1  ;;  %v992_v58 = vpop.eup %991 }
 0x151   :  { %v994_v26 = vpop.eup %993 }
 0x153   :  { %444 = vadd.xlane.f32.xlu0 %v978_v37 }
 0x154   :  { %604 = vadd.xlane.f32.xlu1 %v1585_v40 }
 0x157   :  { %448 = vadd.xlane.f32.xlu0 %v982_v20 }
 0x158   :  { %606 = vadd.xlane.f32.xlu1 %v1588_v13 }
 0x15b   :  { %450 = vadd.xlane.f32.xlu0 %v984_v61 }
 0x15c   :  { %452 = vadd.xlane.f32.xlu1 %v986_v22 }
 0x15f   :  { %454 = vadd.xlane.f32.xlu0 %v988_v9 }
 0x160   :  { %456 = vadd.xlane.f32.xlu1 %v990_v15 }
 0x163   :  { %458 = vadd.xlane.f32.xlu0 %v992_v58 }
 0x164   :  { %460 = vadd.xlane.f32.xlu1 %v994_v26 }
 0x167   :  { %493 = vadd.xlane.f32.xlu0 %v492_v23 }
 0x1b4   :  { %v577_v27 = vpop.xlane.xlu0 %576 }
 0x1b5   :  { %v593_v30 = vpop.xlane.xlu1 %592  ;;  %995 = vrcp.f32 %v577_v27 }
 0x1b8   :  { %v579_v6 = vpop.xlane.xlu0 %578 }
 0x1b9   :  { %v431_v32 = vpop.xlane.xlu1 %430  ;;  %997 = vrcp.f32 %v579_v6 }
 0x1ba   :  { %999 = vrcp.f32 %v593_v30 }
 0x1bc   :  { %v433_v36 = vpop.xlane.xlu0 %432 }
 0x1bd   :  { %v595_v12 = vpop.xlane.xlu1 %594 }
 0x1bf   :  { %v996_v38 = vpop.eup %995 }
 0x1c0   :  { %v435_v43 = vpop.xlane.xlu0 %434  ;;  %v624_v44 = vmul.f32 %v996_v38, %v1398_v31 }
 0x1c1   :  { %v581_v25 = vpop.xlane.xlu1 %580 }
 0x1c2   :  { %1001 = vrcp.f32 %v581_v25  ;;  %v640_v19 = vsub.f32 1.0, %v624_v44 }
 0x1c3   :  { %1003 = vrcp.f32 %v595_v12  ;;  %v998_v45 = vpop.eup %997 }
 0x1c4   :  { %v437_v50 = vpop.xlane.xlu0 %436  ;;  %v625_v23 = vmul.f32 %v998_v45, %v1416_v46  ;;  %v1000_v3 = vpop.eup %999  ;;  %v656_v10 = vsel %vm414_vm2, 1.0, %v640_v19  ;;  %vm534_vm2 = vcmask 7168  }
 0x1c5   :  { %v597_v47 = vpop.xlane.xlu1 %596  ;;  %v632_v53 = vmul.f32 %v1000_v3, %v1400_v33 }
 0x1c6   :  { %1005 = vrcp.f32 %v597_v47  ;;  %v641_v29 = vsub.f32 1.0, %v625_v23 }
 0x1c7   :  { %v648_v58 = vsub.f32 1.0, %v632_v53 }
 0x1c8   :  { %v585_v0 = vpop.xlane.xlu0 %584  ;;  %v657_v20 = vsel %vm415_vm3, 1.0, %v641_v29 }
 0x1c9   :  { %v583_v39 = vpop.xlane.xlu1 %582  ;;  %v664_v12 = vsel %vm422_vm10, 1.0, %v648_v58 }
 0x1ca   :  { %1007 = vrcp.f32 %v583_v39 }
 0x1cb   :  { %1009 = vlog2.f32 %v431_v32 }
 0x1cc   :  { %v1002_v51 = vpop.eup %1001  ;;  %1011 = vrcp.f32 %v585_v0  ;;  %v439_v46 = vpop.xlane.xlu0 %438 }
 0x1cd   :  { %v1004_v31 = vpop.eup %1003  ;;  %1013 = vlog2.f32 %v433_v36  ;;  %v626_v37 = vmul.f32 %v1002_v51, %v1441_v8  ;;  %v599_v11 = vpop.xlane.xlu1 %598 }
 0x1ce   :  { %1015 = vlog2.f32 %v435_v43  ;;  %v633_v22 = vmul.f32 %v1004_v31, %v1431_v60 }
 0x1cf   :  { %1017 = vlog2.f32 %v656_v10  ;;  %v642_v61 = vsub.f32 1.0, %v626_v37 }
 0x1d0   :  { %1019 = vlog2.f32 %v437_v50  ;;  %v441_v9 = vpop.xlane.xlu0 %440  ;;  %v1006_v15 = vpop.eup %1005  ;;  %v649_v59 = vsub.f32 1.0, %v633_v22 }
 0x1d1   :  { %1021 = vlog2.f32 %v657_v20  ;;  %v587_v52 = vpop.xlane.xlu1 %586  ;;  %v658_v8 = vsel %vm416_vm4, 1.0, %v642_v61  ;;  %v634_v27 = vmul.f32 %v1006_v15, %v1467_v24 }
 0x1d2   :  { %1023 = vrcp.f32 %v599_v11  ;;  %v665_v24 = vsel %vm423_vm11, 1.0, %v649_v59 }
 0x1d3   :  { %1025 = vrcp.f32 %v587_v52  ;;  %v650_v43 = vsub.f32 1.0, %v634_v27 }
 0x1d4   :  { %v1008_v33 = vpop.eup %1007  ;;  %1027 = vlog2.f32 %v439_v46  ;;  %v589_v30 = vpop.xlane.xlu0 %588 }
 0x1d5   :  { %v1010_v26 = vpop.eup %1009  ;;  %1029 = vlog2.f32 %v658_v8  ;;  %v627_v60 = vmul.f32 %v1008_v33, %v1515_v63  ;;  %v591_v32 = vpop.xlane.xlu1 %590  ;;  %v666_v7 = vsel %vm424_vm12, 1.0, %v650_v43 }
 0x1d6   :  { %v1012_v6 = vpop.eup %1011  ;;  %1031 = vrcp.f32 %v589_v30  ;;  %v503_v19 = vmul.f32 0.6931472, %v1010_v26 }
 0x1d7   :  { %v1014_v62 = vpop.eup %1013  ;;  %v643_v36 = vsub.f32 1.0, %v627_v60  ;;  %v628_v38 = vmul.f32 %v1012_v6, %v1498_v5  ;;  %1033 = vlog2.f32 %v441_v9 }
 0x1d8   :  { %v1016_v25 = vpop.eup %1015  ;;  %1035 = vrcp.f32 %v591_v32  ;;  %v443_v45 = vpop.xlane.xlu0 %442  ;;  %v505_v23 = vmul.f32 0.6931472, %v1014_v62  ;;  %v535_v11 = vsel %vm534_vm2, %v503_v19, 0.0 }
 0x1d9   :  { %v1018_v63 = vpop.eup %1017  ;;  %1037 = vlog2.f32 %v664_v12  ;;  %v659_v16 = vsel %vm417_vm5, 1.0, %v643_v36  ;;  %v644_v44 = vsub.f32 1.0, %v628_v38  ;;  %v601_v47 = vpop.xlane.xlu1 %600  ;;  %v507_v0 = vmul.f32 0.6931472, %v1016_v25 }
 0x1da   :  { %v1020_v50 = vpop.eup %1019  ;;  %1039 = vlog2.f32 %v659_v16  ;;  %v536_v31 = vsel %vm534_vm2, %v505_v23, 0.0  ;;  %v673_v8 = vmul.f32 0.6931472, %v1018_v63 }
 0x1db   :  { %v1022_v5 = vpop.eup %1021  ;;  %1041 = vlog2.f32 %v665_v24  ;;  %v660_v17 = vsel %vm418_vm6, 1.0, %v644_v44  ;;  %v538_v53 = vsel %vm534_vm2, %v507_v0, 0.0  ;;  %v509_v20 = vmul.f32 0.6931472, %v1020_v50 }
 0x1dc   :  { %v1024_v39 = vpop.eup %1023  ;;  %1043 = vlog2.f32 %v443_v45  ;;  %v447_v3 = vpop.xlane.xlu0 %446  ;;  %v537_v22 = vadd.f32 %v536_v31, %v535_v11  ;;  %v675_v33 = vmul.f32 0.6931472, %v1022_v5 }
 0x1dd   :  { %v1026_v29 = vpop.eup %1025  ;;  %1045 = vrcp.f32 %v601_v47  ;;  %v603_v51 = vpop.xlane.xlu1 %602  ;;  %v635_v52 = vmul.f32 %v1024_v39, %v1529_v2  ;;  %v540_v32 = vsel %vm534_vm2, %v509_v20, 0.0 }
 0x1de   :  { %v1028_v10 = vpop.eup %1027  ;;  %1047 = vlog2.f32 %v660_v17  ;;  %v629_v37 = vmul.f32 %v1026_v29, %v1556_v35  ;;  %v539_v27 = vadd.f32 %v538_v53, %v537_v22  ;;  %v704_v43 = vadd.f32 %v675_v33, %v673_v8 }
 0x1df   :  { %v1030_v28 = vpop.eup %1029  ;;  %1049 = vrcp.f32 %v603_v51  ;;  %v511_v6 = vmul.f32 0.6931472, %v1028_v10  ;;  %v651_v62 = vsub.f32 1.0, %v635_v52 }
 0x1e0   :  { %v1032_v46 = vpop.eup %1031  ;;  %1051 = vlog2.f32 %v666_v7  ;;  %v645_v18 = vsub.f32 1.0, %v629_v37  ;;  %v445_v58 = vpop.xlane.xlu0 %444  ;;  %v541_v44 = vadd.f32 %v540_v32, %v539_v27 }
 0x1e1   :  { %v1034_v61 = vpop.eup %1033  ;;  %v630_v9 = vmul.f32 %v1032_v46, %v1571_v49  ;;  %1053 = vlog2.f32 %v447_v3  ;;  %v605_v15 = vpop.xlane.xlu1 %604  ;;  %v677_v49 = vmul.f32 0.6931472, %v1030_v28  ;;  %v542_v23 = vsel %vm534_vm2, %v511_v6, 0.0 }
 0x1e2   :  { %v1036_v35 = vpop.eup %1035  ;;  %v661_v59 = vsel %vm419_vm7, 1.0, %v645_v18  ;;  %1055 = vrcp.f32 %v605_v15  ;;  %v513_v36 = vmul.f32 0.6931472, %v1034_v61  ;;  %v667_v19 = vsel %vm425_vm13, 1.0, %v651_v62 }
 0x1e3   :  { %v1632_v26 = vpop.eup %1037  ;;  %1057 = vlog2.f32 %v661_v59  ;;  %v646_v60 = vsub.f32 1.0, %v630_v9  ;;  %v631_v2 = vmul.f32 %v1036_v35, %v1565_v34  ;;  %v705_v50 = vadd.f32 %v704_v43, %v677_v49 }
 0x1e4   :  { %v1040_v30 = vpop.eup %1039  ;;  %1059 = vlog2.f32 %v445_v58  ;;  %v449_v24 = vpop.xlane.xlu0 %448  ;;  %v544_v17 = vsel %vm534_vm2, %v513_v36, 0.0  ;;  %v689_v42 = vmul.f32 0.6931472, %v1632_v26 }
 0x1e5   :  { %v1636_v12 = vpop.eup %1041  ;;  %v662_v41 = vsel %vm420_vm8, 1.0, %v646_v60  ;;  %v647_v38 = vsub.f32 1.0, %v631_v2  ;;  %v607_v25 = vpop.xlane.xlu1 %606  ;;  %v679_v34 = vmul.f32 0.6931472, %v1040_v30 }
 0x1e6   :  { %v1044_v63 = vpop.eup %1043  ;;  %1061 = vlog2.f32 %v662_v41 }
 0x1e7   :  { %v1046_v16 = vpop.eup %1045  ;;  %v663_v45 = vsel %vm421_vm9, 1.0, %v647_v38  ;;  %1063 = vrcp.f32 %v607_v25  ;;  %v515_v39 = vmul.f32 0.6931472, %v1044_v63  ;;  %v706_v7 = vadd.f32 %v705_v50, %v679_v34 }
 0x1e8   :  { %v1048_v47 = vpop.eup %1047  ;;  %1065 = vlog2.f32 %v663_v45  ;;  %v636_v55 = vmul.f32 %v1046_v16, %v1575_v54  ;;  %v451_v4 = vpop.xlane.xlu0 %450  ;;  %v543_v54 = vadd.f32 %v542_v23, %v541_v44 }
 0x1e9   :  { %v1050_v5 = vpop.eup %1049  ;;  %1067 = vlog2.f32 %v449_v24  ;;  %v453_v0 = vpop.xlane.xlu1 %452  ;;  %v681_v37 = vmul.f32 0.6931472, %v1048_v47  ;;  %v546_v46 = vsel %vm534_vm2, %v515_v39, 0.0 }
 0x1ea   :  { %v1650_v29 = vpop.eup %1051  ;;  %v652_v3 = vsub.f32 1.0, %v636_v55  ;;  %v637_v51 = vmul.f32 %v1050_v5, %v1580_v1  ;;  %1069 = vlog2.f32 %v453_v0  ;;  %v545_v11 = vadd.f32 %v544_v17, %v543_v54 }
 0x1eb   :  { %v1054_v10 = vpop.eup %1053  ;;  %1071 = vlog2.f32 %v451_v4  ;;  %v707_v22 = vadd.f32 %v706_v7, %v681_v37  ;;  %v691_v5 = vmul.f32 0.6931472, %v1636_v12  ;;  %v693_v7 = vmul.f32 0.6931472, %v1650_v29 }
 0x1ec   :  { %v1056_v31 = vpop.eup %1055  ;;  %v653_v21 = vsub.f32 1.0, %v637_v51  ;;  %1073 = vlog2.f32 %v667_v19  ;;  %v455_v20 = vpop.xlane.xlu0 %454  ;;  %v668_v1 = vsel %vm426_vm14, 1.0, %v652_v3  ;;  %v519_v15 = vmul.f32 0.6931472, %v1054_v10 }
 0x1ed   :  { %v1058_v28 = vpop.eup %1057  ;;  %v457_v53 = vpop.xlane.xlu1 %456  ;;  %v638_v18 = vmul.f32 %v1056_v31, %v1585_v40  ;;  %v547_v59 = vadd.f32 %v546_v46, %v545_v11 }
 0x1ee   :  { %v1060_v61 = vpop.eup %1059  ;;  %v683_v52 = vmul.f32 0.6931472, %v1058_v28  ;;  %1075 = vlog2.f32 %v457_v53  ;;  %v669_v9 = vsel %vm427_vm15, 1.0, %v653_v21  ;;  %v550_v41 = vsel %vm534_vm2, %v519_v15, 0.0 }
 0x1ef   :  { %v517_v58 = vmul.f32 0.6931472, %v1060_v61  ;;  %1077 = vlog2.f32 %v455_v20  ;;  %v654_v35 = vsub.f32 1.0, %v638_v18 }
 0x1f0   :  { %v1062_v8 = vpop.eup %1061  ;;  %v708_v33 = vadd.f32 %v707_v22, %v683_v52  ;;  %1079 = vlog2.f32 %v668_v1  ;;  %v459_v2 = vpop.xlane.xlu0 %458 }
 0x1f1   :  { %v1064_v40 = vpop.eup %1063  ;;  %v685_v27 = vmul.f32 0.6931472, %v1062_v8  ;;  %v548_v57 = vsel %vm534_vm2, %v517_v58, 0.0  ;;  %v461_v60 = vpop.xlane.xlu1 %460  ;;  %v670_v30 = vsel %vm428_vm0, 1.0, %v654_v35  ;;  %1081 = vlog2.f32 %v669_v9 }
 0x1f2   :  { %v1066_v48 = vpop.eup %1065  ;;  %v549_v49 = vadd.f32 %v548_v57, %v547_v59  ;;  %1083 = vlog2.f32 %v461_v60  ;;  %v639_v32 = vmul.f32 %v1064_v40, %v1588_v13 }
 0x1f3   :  { %v1068_v6 = vpop.eup %1067  ;;  %v709_v62 = vadd.f32 %v708_v33, %v685_v27  ;;  %v687_v36 = vmul.f32 0.6931472, %v1066_v48  ;;  %1085 = vlog2.f32 %v459_v2 }
 0x1f4   :  { %v1070_v38 = vpop.eup %1069  ;;  %v551_v25 = vadd.f32 %v550_v41, %v549_v49  ;;  %v521_v24 = vmul.f32 0.6931472, %v1068_v6  ;;  %v655_v63 = vsub.f32 1.0, %v639_v32  ;;  %1087 = vlog2.f32 %v670_v30  ;;  %v494_v16 = vpop.xlane.xlu0 %493 }
 0x1f5   :  { %v1072_v43 = vpop.eup %1071  ;;  %v525_v34 = vmul.f32 0.6931472, %v1070_v38  ;;  %v710_v44 = vadd.f32 %v709_v62, %v687_v36  ;;  %v495_v50 = vrot.slane %v494_v16, 4 }
 0x1f6   :  { %v1074_v45 = vpop.eup %1073  ;;  %v552_v13 = vsel %vm534_vm2, %v521_v24, 0.0  ;;  %v523_v47 = vmul.f32 0.6931472, %v1072_v43  ;;  %v671_v23 = vsel %vm429_vm1, 1.0, %v655_v63 }
 0x1f7   :  { %v553_v55 = vadd.f32 %v552_v13, %v551_v25  ;;  %1089 = vlog2.f32 %v671_v23  ;;  %v711_v19 = vadd.f32 %v710_v44, %v689_v42  ;;  %v496_v39 = vadd.f32 %v495_v50, %v494_v16 }
 0x1f8   :  { %v1076_v17 = vpop.eup %1075  ;;  %v554_v26 = vsel %vm534_vm2, %v523_v47, 0.0  ;;  %v556_v10 = vsel %vm534_vm2, %v525_v34, 0.0  ;;  %v695_v12 = vmul.f32 0.6931472, %v1074_v45 }
 0x1f9   :  { %v1078_v0 = vpop.eup %1077  ;;  %v555_v4 = vadd.f32 %v554_v26, %v553_v55  ;;  %v712_v3 = vadd.f32 %v711_v19, %v691_v5  ;;  %v529_v54 = vmul.f32 0.6931472, %v1076_v17  ;;  %v497_v14 = vrot.slane %v496_v39, 2 }
 0x1fa   :  { %v1080_v51 = vpop.eup %1079  ;;  %v527_v56 = vmul.f32 0.6931472, %v1078_v0 }
 0x1fb   :  { %v1082_v31 = vpop.eup %1081  ;;  %v557_v37 = vadd.f32 %v556_v10, %v555_v4  ;;  %v713_v21 = vadd.f32 %v712_v3, %v693_v7  ;;  %v498_v46 = vadd.f32 %v497_v14, %v496_v39  ;;  %v697_v18 = vmul.f32 0.6931472, %v1080_v51 }
 0x1fc   :  { %v1084_v28 = vpop.eup %1083  ;;  %v558_v11 = vsel %vm534_vm2, %v527_v56, 0.0  ;;  %v560_v61 = vsel %vm534_vm2, %v529_v54, 0.0  ;;  %v699_v58 = vmul.f32 0.6931472, %v1082_v31 }
 0x1fd   :  { %v1086_v53 = vpop.eup %1085  ;;  %v559_v20 = vadd.f32 %v558_v11, %v557_v37  ;;  %v714_v1 = vadd.f32 %v713_v21, %v695_v12  ;;  %v533_v22 = vmul.f32 0.6931472, %v1084_v28  ;;  %v499_v9 = vrot.slane %v498_v46, 1 }
 0x1fe   :  { %v1088_v29 = vpop.eup %1087  ;;  %v531_v52 = vmul.f32 0.6931472, %v1086_v53 }
 0x1ff   :  { %v561_v15 = vadd.f32 %v560_v61, %v559_v20  ;;  %v715_v35 = vadd.f32 %v714_v1, %v697_v18  ;;  %v500_v8 = vadd.f32 %v499_v9, %v498_v46  ;;  %v701_v27 = vmul.f32 0.6931472, %v1088_v29 }
 0x200   :  { %v562_v33 = vsel %vm534_vm2, %v531_v52, 0.0  ;;  %v564_v60 = vsel %vm534_vm2, %v533_v22, 0.0 }
 0x201   :  { %v1090_v59 = vpop.eup %1089  ;;  %v563_v40 = vadd.f32 %v562_v33, %v561_v15  ;;  %v716_v57 = vadd.f32 %v715_v35, %v699_v58  ;;  %924 = vpush %v500_v8 }
 0x202   :  { %v703_v30 = vmul.f32 0.6931472, %v1090_v59 }
 0x203   :  { %v565_v2 = vadd.f32 %v564_v60, %v563_v40  ;;  %v717_v48 = vadd.f32 %v716_v57, %v701_v27 }
 0x205   :  { %566 = vadd.xlane.f32.xlu1 %v565_v2  ;;  %v718_v49 = vadd.f32 %v717_v48, %v703_v30 }
 0x207   :  { %719 = vadd.xlane.f32.xlu0 %v718_v49 }
 0x232   :  { %s925_s0 = spop %924 }
 0x292   :  { %v567_v32 = vpop.xlane.xlu1 %566 }
 0x293   :  { %v568_v6 = vrot.slane %v567_v32, 4 }
 0x294   :  { %v720_v62 = vpop.xlane.xlu0 %719 }
 0x295   :  { %v569_v36 = vadd.f32 %v568_v6, %v567_v32  ;;  %v721_v41 = vrot.slane %v720_v62, 4 }
 0x297   :  { %v570_v38 = vrot.slane %v569_v36, 2  ;;  %v722_v25 = vadd.f32 %v721_v41, %v720_v62 }
 0x299   :  { %v571_v24 = vadd.f32 %v570_v38, %v569_v36  ;;  %v723_v63 = vrot.slane %v722_v25, 2 }
 0x29b   :  { %v724_v43 = vadd.f32 %v723_v63, %v722_v25  ;;  %v572_v42 = vrot.slane %v571_v24, 1 }
 0x29d   :  { %v573_v34 = vadd.f32 %v572_v42, %v571_v24  ;;  %v725_v16 = vrot.slane %v724_v43, 1 }
 0x29f   :  { %926 = vpush %v573_v34  ;;  %v726_v44 = vadd.f32 %v725_v16, %v724_v43 }
 0x2a1   :  { %928 = vpush %v726_v44 }
 0x2d0   :  { %s927_s12 = spop %926 }
 0x2d1   :  { %s575_s13 = ssub.f32 %s925_s0, %s927_s12 }
 0x2d2   :  { %s929_s14 = spop %928 }
 0x2d3   :  { %s728_s15 = ssub.f32 0.0, %s575_s13 }
 0x2d5   :  { %s729_s16 = ssub.f32 %s728_s15, %s929_s14 }
 0x2d7   :  { %s732_s17 = smul.f32 0.0078125, %s729_s16 }
 0x2d9   :  { %734 = sst [smem:[#allocation2]] %s732_s17 }
 0x2da   :  { %1100 = shalt.err (!%p1097_p2)
}
 0x2db   :  { %s1103_s25 = smov [#allocation2]  }
 0x2dc   :  { %742 = dma.smem_to_hbm %s1103_s25, 16, %s1693_s1, [#allocation3]  }
 0x2dd   :  { %1101 = dma.done.wait [#allocation3], 16  }
 0x2de   :  { %1102 = vsyncadd [#allocation3], 4294967280 }
 0x2df   :  { %746 = sfence }
 0x2e0   :  { %747 = vsyncpa [#allocation3], 1 }

</bundles_post_ra>
